<compile_context>
chip_gen: v6e
topology: v6e:2x2x1
jax: 0.10.0
libtpu: 0.0.40
codegen_flags: <defaults>
</compile_context>

<pallas_src>
import functools

import jax
import jax.numpy as jnp
from jax.experimental import pallas as pl
from jax.experimental.pallas import tpu as pltpu

LANE = 128


def _round_up(n, m):
    return ((n + m - 1) // m) * m


# ----------------------------------------------------------------------------
# Kernel: one batch tile per grid step, full fused 4-layer MLP.
# ----------------------------------------------------------------------------
def nnet_kernel(x_ref,
                w1_ref, b1_ref,
                w2_ref, b2_ref,
                w3_ref, b3_ref,
                w4_ref, b4_ref,
                o_ref):
    # Layer 1: [TB, in] @ [in, 128]  (x already bf16; accumulate f32)
    h = jnp.dot(x_ref[...], w1_ref[...],
                preferred_element_type=jnp.float32) + b1_ref[...]
    h = jnp.maximum(h, 0.0)

    # Layer 2: [TB, 128] @ [128, 256]
    h = jnp.dot(h.astype(jnp.bfloat16), w2_ref[...],
                preferred_element_type=jnp.float32) + b2_ref[...]
    h = jnp.maximum(h, 0.0)

    # Layer 3: [TB, 256] @ [256, 128]
    h = jnp.dot(h.astype(jnp.bfloat16), w3_ref[...],
                preferred_element_type=jnp.float32) + b3_ref[...]
    h = jnp.maximum(h, 0.0)

    # Layer 4: [TB, 128] @ [128, out_pad]  (lane-dense f32 store)
    y = jnp.dot(h.astype(jnp.bfloat16), w4_ref[...],
                preferred_element_type=jnp.float32) + b4_ref[...]
    o_ref[...] = y.astype(o_ref.dtype)


# ----------------------------------------------------------------------------
# Wrapper
# ----------------------------------------------------------------------------
def nnet_forward(x, padded_params, out_features, *, tb=256):
    """x: [B, inputs] float32.  padded_params: output of prepare_params().

    Returns [B, out_features] float32.
    """
    B, in_dim = x.shape
    w1, b1 = padded_params["w1"], padded_params["b1"]
    w2, b2 = padded_params["w2"], padded_params["b2"]
    w3, b3 = padded_params["w3"], padded_params["b3"]
    w4, b4 = padded_params["w4"], padded_params["b4"]
    out_pad = w4.shape[1]

    # Batch tile: <= tb (keep TB*256 f32 intermediate off the spill path),
    # multiple of 8 (sublane), pad the batch up to a whole number of tiles.
    tb_eff = min(tb, _round_up(B, 8))
    b_pad = _round_up(B, tb_eff)

    x_bf16 = x.astype(jnp.bfloat16)
    if b_pad != B:
        x_bf16 = jnp.pad(x_bf16, ((0, b_pad - B), (0, 0)))

    grid = (b_pad // tb_eff,)

    flops = 2 * b_pad * (in_dim * w1.shape[1]
                         + w2.shape[0] * w2.shape[1]
                         + w3.shape[0] * w3.shape[1]
                         + w4.shape[0] * out_pad)
    bytes_accessed = (
        x_bf16.size * 2 + b_pad * out_pad * 4
        + sum(w.size * 2 for w in (w1, w2, w3, w4))
        + sum(b.size * 4 for b in (b1, b2, b3, b4)))

    out = pl.pallas_call(
        nnet_kernel,
        out_shape=jax.ShapeDtypeStruct((b_pad, out_pad), jnp.float32),
        grid=grid,
        in_specs=[
            # Activations: one batch tile per grid step.
            pl.BlockSpec((tb_eff, in_dim), lambda i: (i, 0)),
            # Weights / biases: constant block -> stay resident in VMEM.
            pl.BlockSpec(w1.shape, lambda i: (0, 0)),
            pl.BlockSpec(b1.shape, lambda i: (0, 0)),
            pl.BlockSpec(w2.shape, lambda i: (0, 0)),
            pl.BlockSpec(b2.shape, lambda i: (0, 0)),
            pl.BlockSpec(w3.shape, lambda i: (0, 0)),
            pl.BlockSpec(b3.shape, lambda i: (0, 0)),
            pl.BlockSpec(w4.shape, lambda i: (0, 0)),
            pl.BlockSpec(b4.shape, lambda i: (0, 0)),
        ],
        out_specs=pl.BlockSpec((tb_eff, out_pad), lambda i: (i, 0)),
        compiler_params=pltpu.CompilerParams(
            dimension_semantics=("parallel",)),
        cost_estimate=pl.CostEstimate(
            flops=flops, transcendentals=0, bytes_accessed=bytes_accessed),
    )(x_bf16, w1, b1, w2, b2, w3, b3, w4, b4)

    # Strip batch padding and the lane padding on the output features.
    return out[:B, :out_features]


# ----------------------------------------------------------------------------
# Parameter construction / preparation
# ----------------------------------------------------------------------------
def init_nnet_params(key, inputs, outputs):
    """f32 params mimicking nn.Linear default init: U(-1/sqrt(fan_in), +).

    Weights stored as [in_features, out_features] (transposed vs torch) so the
    kernel computes y = x @ W + b.  Biases are [1, out_features].
    """
    dims = [(inputs, 100), (100, 200), (200, 100), (100, outputs)]
    params = {}
    for i, (fan_in, fan_out) in enumerate(dims, start=1):
        key, kw, kb = jax.random.split(key, 3)
        bound = 1.0 / jnp.sqrt(jnp.float32(fan_in))
        params[f"w{i}"] = jax.random.uniform(
            kw, (fan_in, fan_out), jnp.float32, -bound, bound)
        params[f"b{i}"] = jax.random.uniform(
            kb, (1, fan_out), jnp.float32, -bound, bound)
    return params


def prepare_params(params, inputs, outputs):
    """Zero-pad feature dims to lane multiples and cast weights to bf16.

    Zero padding keeps the math identical: padded hidden units get weight 0
    and bias 0, so they stay 0 through ReLU and contribute nothing downstream.
    """
    dims = [(inputs, 100), (100, 200), (200, 100), (100, outputs)]
    prepared = {}
    for i, (fan_in, fan_out) in enumerate(dims, start=1):
        fan_in_p = fan_in if i == 1 else _round_up(fan_in, LANE)
        fan_out_p = _round_up(fan_out, LANE)
        w = params[f"w{i}"]
        b = params[f"b{i}"]
        w_p = jnp.zeros((fan_in_p, fan_out_p), jnp.float32)
        w_p = w_p.at[:fan_in, :fan_out].set(w)
        b_p = jnp.zeros((1, fan_out_p), jnp.float32)
        b_p = b_p.at[:, :fan_out].set(b)
        prepared[f"w{i}"] = w_p.astype(jnp.bfloat16)   # MXU operand
        prepared[f"b{i}"] = b_p                        # f32 bias (VPU)
    return prepared


# ----------------------------------------------------------------------------
# References
# ----------------------------------------------------------------------------
def nnet_reference_bf16(x, params):
    """Same numerics as the kernel: bf16 matmul operands, f32 accumulation."""
    def lin(h, w, b):
        return jnp.dot(h.astype(jnp.bfloat16), w.astype(jnp.bfloat16),
                       preferred_element_type=jnp.float32) + b
    h = jnp.maximum(lin(x, params["w1"], params["b1"]), 0.0)
    h = jnp.maximum(lin(h, params["w2"], params["b2"]), 0.0)
    h = jnp.maximum(lin(h, params["w3"], params["b3"]), 0.0)
    return lin(h, params["w4"], params["b4"])


def nnet_reference_f32(x, params):
    """Pure f32 reference (matches the PyTorch module semantics)."""
    h = jnp.maximum(x @ params["w1"] + params["b1"], 0.0)
    h = jnp.maximum(h @ params["w2"] + params["b2"], 0.0)
    h = jnp.maximum(h @ params["w3"] + params["b3"], 0.0)
    return h @ params["w4"] + params["b4"]


if __name__ == "__main__":
    key = jax.random.PRNGKey(0)
    key, kx, kp = jax.random.split(key, 3)

    batch, inputs, outputs = 8, 32, 16
    x = jax.random.normal(kx, (batch, inputs), jnp.float32)

    params = init_nnet_params(kp, inputs, outputs)
    padded_params = prepare_params(params, inputs, outputs)

    out = nnet_forward(x, padded_params, outputs)
    out = jax.block_until_ready(out)
    assert out.shape == (batch, outputs)

    # Strict check vs a reference with identical (bf16-operand) numerics.
    ref_bf16 = nnet_reference_bf16(x, params)
    assert jnp.allclose(out, ref_bf16, atol=1e-3, rtol=1e-3), (
        float(jnp.max(jnp.abs(out - ref_bf16))))

    # Loose sanity check vs the pure-f32 PyTorch-equivalent reference.
    ref_f32 = nnet_reference_f32(x, params)
    assert jnp.allclose(out, ref_f32, atol=5e-2, rtol=5e-2), (
        float(jnp.max(jnp.abs(out - ref_f32))))

    print("KERNEL_OK")
</pallas_src>

<mosaic_0001>
module attributes {stable_mosaic.version = 11 : i64} {
  func.func @nnet_kernel(%arg0: i32, %arg1: memref<8x32xbf16, #tpu.memory_space<vmem>>, %arg2: memref<32x128xbf16, #tpu.memory_space<vmem>>, %arg3: memref<1x128xf32, #tpu.memory_space<vmem>>, %arg4: memref<128x256xbf16, #tpu.memory_space<vmem>>, %arg5: memref<1x256xf32, #tpu.memory_space<vmem>>, %arg6: memref<256x128xbf16, #tpu.memory_space<vmem>>, %arg7: memref<1x128xf32, #tpu.memory_space<vmem>>, %arg8: memref<128x128xbf16, #tpu.memory_space<vmem>>, %arg9: memref<1x128xf32, #tpu.memory_space<vmem>>, %arg10: memref<8x128xf32, #tpu.memory_space<vmem>>) attributes {dimension_semantics = [#tpu.dimension_semantics<parallel>], iteration_bounds = array<i64: 1>, scalar_prefetch = 0 : i64, scratch_operands = 0 : i64, tpu.core_type = #tpu.core_type<tc>, window_params = [{transform_indices = @transform_0, window_bounds = array<i64: 8, 32>}, {pipeline_mode = #tpu.pipeline_mode<synchronous>, transform_indices = @transform_1, window_bounds = array<i64: 32, 128>}, {pipeline_mode = #tpu.pipeline_mode<synchronous>, transform_indices = @transform_2, window_bounds = array<i64: 1, 128>}, {pipeline_mode = #tpu.pipeline_mode<synchronous>, transform_indices = @transform_3, window_bounds = array<i64: 128, 256>}, {pipeline_mode = #tpu.pipeline_mode<synchronous>, transform_indices = @transform_4, window_bounds = array<i64: 1, 256>}, {pipeline_mode = #tpu.pipeline_mode<synchronous>, transform_indices = @transform_5, window_bounds = array<i64: 256, 128>}, {pipeline_mode = #tpu.pipeline_mode<synchronous>, transform_indices = @transform_6, window_bounds = array<i64: 1, 128>}, {pipeline_mode = #tpu.pipeline_mode<synchronous>, transform_indices = @transform_7, window_bounds = array<i64: 128, 128>}, {pipeline_mode = #tpu.pipeline_mode<synchronous>, transform_indices = @transform_8, window_bounds = array<i64: 1, 128>}, {transform_indices = @transform_9, window_bounds = array<i64: 8, 128>}]} {
    %c0 = arith.constant 0 : index
    %c0_0 = arith.constant 0 : index
    %0 = vector.load %arg1[%c0, %c0_0] : memref<8x32xbf16, #tpu.memory_space<vmem>>, vector<8x32xbf16>
    %c0_1 = arith.constant 0 : index
    %c0_2 = arith.constant 0 : index
    %1 = vector.load %arg2[%c0_1, %c0_2] : memref<32x128xbf16, #tpu.memory_space<vmem>>, vector<32x128xbf16>
    %cst = arith.constant dense<0.000000e+00> : vector<8x128xf32>
    %2 = tpu.matmul %0, %1, %cst {dimension_numbers = #tpu.dot_dimension_numbers<[1], [0], [0], [1], [0, 0, 1, 1], [], []>} : vector<8x32xbf16>, vector<32x128xbf16>, vector<8x128xf32> -> vector<8x128xf32>
    %c0_3 = arith.constant 0 : index
    %c0_4 = arith.constant 0 : index
    %3 = vector.load %arg3[%c0_3, %c0_4] : memref<1x128xf32, #tpu.memory_space<vmem>>, vector<1x128xf32>
    %4 = vector.broadcast %3 : vector<1x128xf32> to vector<8x128xf32>
    %5 = arith.addf %2, %4 : vector<8x128xf32>
    %cst_5 = arith.constant 0.000000e+00 : f32
    %6 = vector.broadcast %cst_5 : f32 to vector<8x128xf32>
    %7 = arith.maximumf %5, %6 : vector<8x128xf32>
    %8 = arith.truncf %7 : vector<8x128xf32> to vector<8x128xbf16>
    %c0_6 = arith.constant 0 : index
    %c0_7 = arith.constant 0 : index
    %9 = vector.load %arg4[%c0_6, %c0_7] : memref<128x256xbf16, #tpu.memory_space<vmem>>, vector<128x256xbf16>
    %cst_8 = arith.constant dense<0.000000e+00> : vector<8x256xf32>
    %10 = tpu.matmul %8, %9, %cst_8 {dimension_numbers = #tpu.dot_dimension_numbers<[1], [0], [0], [1], [0, 0, 1, 1], [], []>} : vector<8x128xbf16>, vector<128x256xbf16>, vector<8x256xf32> -> vector<8x256xf32>
    %c0_9 = arith.constant 0 : index
    %c0_10 = arith.constant 0 : index
    %11 = vector.load %arg5[%c0_9, %c0_10] : memref<1x256xf32, #tpu.memory_space<vmem>>, vector<1x256xf32>
    %12 = vector.broadcast %11 : vector<1x256xf32> to vector<8x256xf32>
    %13 = arith.addf %10, %12 : vector<8x256xf32>
    %cst_11 = arith.constant 0.000000e+00 : f32
    %14 = vector.broadcast %cst_11 : f32 to vector<8x256xf32>
    %15 = arith.maximumf %13, %14 : vector<8x256xf32>
    %16 = arith.truncf %15 : vector<8x256xf32> to vector<8x256xbf16>
    %c0_12 = arith.constant 0 : index
    %c0_13 = arith.constant 0 : index
    %17 = vector.load %arg6[%c0_12, %c0_13] : memref<256x128xbf16, #tpu.memory_space<vmem>>, vector<256x128xbf16>
    %cst_14 = arith.constant dense<0.000000e+00> : vector<8x128xf32>
    %18 = tpu.matmul %16, %17, %cst_14 {dimension_numbers = #tpu.dot_dimension_numbers<[1], [0], [0], [1], [0, 0, 1, 1], [], []>} : vector<8x256xbf16>, vector<256x128xbf16>, vector<8x128xf32> -> vector<8x128xf32>
    %c0_15 = arith.constant 0 : index
    %c0_16 = arith.constant 0 : index
    %19 = vector.load %arg7[%c0_15, %c0_16] : memref<1x128xf32, #tpu.memory_space<vmem>>, vector<1x128xf32>
    %20 = vector.broadcast %19 : vector<1x128xf32> to vector<8x128xf32>
    %21 = arith.addf %18, %20 : vector<8x128xf32>
    %cst_17 = arith.constant 0.000000e+00 : f32
    %22 = vector.broadcast %cst_17 : f32 to vector<8x128xf32>
    %23 = arith.maximumf %21, %22 : vector<8x128xf32>
    %24 = arith.truncf %23 : vector<8x128xf32> to vector<8x128xbf16>
    %c0_18 = arith.constant 0 : index
    %c0_19 = arith.constant 0 : index
    %25 = vector.load %arg8[%c0_18, %c0_19] : memref<128x128xbf16, #tpu.memory_space<vmem>>, vector<128x128xbf16>
    %cst_20 = arith.constant dense<0.000000e+00> : vector<8x128xf32>
    %26 = tpu.matmul %24, %25, %cst_20 {dimension_numbers = #tpu.dot_dimension_numbers<[1], [0], [0], [1], [0, 0, 1, 1], [], []>} : vector<8x128xbf16>, vector<128x128xbf16>, vector<8x128xf32> -> vector<8x128xf32>
    %c0_21 = arith.constant 0 : index
    %c0_22 = arith.constant 0 : index
    %27 = vector.load %arg9[%c0_21, %c0_22] : memref<1x128xf32, #tpu.memory_space<vmem>>, vector<1x128xf32>
    %28 = vector.broadcast %27 : vector<1x128xf32> to vector<8x128xf32>
    %29 = arith.addf %26, %28 : vector<8x128xf32>
    %c0_23 = arith.constant 0 : index
    %c0_24 = arith.constant 0 : index
    %30 = vector.load %arg10[%c0_23, %c0_24] : memref<8x128xf32, #tpu.memory_space<vmem>>, vector<8x128xf32>
    tpu.vector_store %arg10[%c0_23, %c0_24], %29 {strides = array<i32>} : memref<8x128xf32, #tpu.memory_space<vmem>>, vector<8x128xf32>,
    return
  }
  func.func @transform_0(%arg0: i32) -> (i32, i32) {
    %c0_i32 = arith.constant 0 : i32
    %c0_i32_0 = arith.constant 0 : i32
    return %arg0, %c0_i32 : i32, i32
  }
  func.func @transform_1(%arg0: i32) -> (i32, i32) {
    %c0_i32 = arith.constant 0 : i32
    %c0_i32_0 = arith.constant 0 : i32
    %c0_i32_1 = arith.constant 0 : i32
    return %c0_i32, %c0_i32_0 : i32, i32
  }
  func.func @transform_2(%arg0: i32) -> (i32, i32) {
    %c0_i32 = arith.constant 0 : i32
    %c0_i32_0 = arith.constant 0 : i32
    %c0_i32_1 = arith.constant 0 : i32
    return %c0_i32, %c0_i32_0 : i32, i32
  }
  func.func @transform_3(%arg0: i32) -> (i32, i32) {
    %c0_i32 = arith.constant 0 : i32
    %c0_i32_0 = arith.constant 0 : i32
    %c0_i32_1 = arith.constant 0 : i32
    return %c0_i32, %c0_i32_0 : i32, i32
  }
  func.func @transform_4(%arg0: i32) -> (i32, i32) {
    %c0_i32 = arith.constant 0 : i32
    %c0_i32_0 = arith.constant 0 : i32
    %c0_i32_1 = arith.constant 0 : i32
    return %c0_i32, %c0_i32_0 : i32, i32
  }
  func.func @transform_5(%arg0: i32) -> (i32, i32) {
    %c0_i32 = arith.constant 0 : i32
    %c0_i32_0 = arith.constant 0 : i32
    %c0_i32_1 = arith.constant 0 : i32
    return %c0_i32, %c0_i32_0 : i32, i32
  }
  func.func @transform_6(%arg0: i32) -> (i32, i32) {
    %c0_i32 = arith.constant 0 : i32
    %c0_i32_0 = arith.constant 0 : i32
    %c0_i32_1 = arith.constant 0 : i32
    return %c0_i32, %c0_i32_0 : i32, i32
  }
  func.func @transform_7(%arg0: i32) -> (i32, i32) {
    %c0_i32 = arith.constant 0 : i32
    %c0_i32_0 = arith.constant 0 : i32
    %c0_i32_1 = arith.constant 0 : i32
    return %c0_i32, %c0_i32_0 : i32, i32
  }
  func.func @transform_8(%arg0: i32) -> (i32, i32) {
    %c0_i32 = arith.constant 0 : i32
    %c0_i32_0 = arith.constant 0 : i32
    %c0_i32_1 = arith.constant 0 : i32
    return %c0_i32, %c0_i32_0 : i32, i32
  }
  func.func @transform_9(%arg0: i32) -> (i32, i32) {
    %c0_i32 = arith.constant 0 : i32
    %c0_i32_0 = arith.constant 0 : i32
    return %arg0, %c0_i32 : i32, i32
  }
}

</mosaic_0001>

<bundles_post_ra>
// kernel: tpu_custom_call.1
= control target key start
LH: loop header
LB: loop body
LE: loop exit
PB: predicated region body
PF: predicated region fallthrough
CT: control target
= control target key end

     0   :  { %14 = vsyncpa [#allocation3], 0  ;;  %s1044_s0 = inlined_call_operand.hbm [shape: bf16[8,32], index: 0, kind: input, shape index: {}]   ;;  %s1045_s1 = inlined_call_operand.hbm [shape: bf16[32,128], index: 1, kind: input, shape index: {}]   ;;  %s1046_s2 = inlined_call_operand.vmem [shape: f32[1,128], index: 2, kind: input, shape index: {}]   ;;  %s1047_s3 = inlined_call_operand.hbm [shape: bf16[128,256], index: 3, kind: input, shape index: {}]   ;;  %s1048_s4 = inlined_call_operand.vmem [shape: f32[1,256], index: 4, kind: input, shape index: {}]   ;;  %s1049_s5 = inlined_call_operand.hbm [shape: bf16[256,128], index: 5, kind: input, shape index: {}]   ;;  %s1050_s6 = inlined_call_operand.vmem [shape: f32[1,128], index: 6, kind: input, shape index: {}]   ;;  %s1051_s7 = inlined_call_operand.hbm [shape: bf16[128,128], index: 7, kind: input, shape index: {}]   ;;  %s1052_s8 = inlined_call_operand.vmem [shape: f32[1,128], index: 8, kind: input, shape index: {}]   ;;  %s1053_s9 = inlined_call_operand.hbm [shape: f32[8,128], index: 9, kind: output, shape index: {}]  }
   0x1   :  { %15 = vsyncpa [#allocation6], 0 }
   0x2   :  { %16 = vsyncpa [#allocation9], 0 }
   0x3   :  { %17 = vsyncpa [#allocation4], 0  ;;  %s928_s30 = smov [#allocation5]  }
   0x4   :  { %s33_s10 = sshll.u32 %s928_s30, 4  ;;  %s34_s10 = int_to_ptr.vmem [resolvable:$true] %s33_s10 }
   0x5   :  { %s808_s11 = scalar_lea.vmem %s34_s10, 256  ;;  %p813_p1 = scmp.lt.s32.totalorder %s34_s10, %s34_s10 }
   0x6   :  { %p809_p0 = scmp.ne.s32.totalorder %s34_s10, %s808_s11  ;;  %p814_p2 = scmp.lt.s32.totalorder %s808_s11, %s808_s11 }
   0x8   :  { %p815_p3 = por %p814_p2, %p813_p1 }
   0xa   :  { %p816_p4 = pnand %p815_p3, %p809_p0 }
   0xc   :  { %819 = shalt.err (!%p816_p4)
}
   0xd   :  { %s929_s12 = smov 64   ;;  %s930_s13 = smov 4  }
   0xe   :  { %39 = dma.hbm_to_vmem [thread:$0]  %s1045_s1, 256, %s34_s10, [#allocation6], %s929_s12, %s929_s12, %s930_s13  }
   0xf   :  { %s931_s16 = smov [#allocation8]   ;;  %s932_s18 = smov [#allocation2]  }
  0x10   :  { %s61_s17 = sshll.u32 %s931_s16, 4  ;;  %s24_s19 = sshll.u32 %s932_s18, 4  ;;  %s62_s17 = int_to_ptr.vmem [resolvable:$true] %s61_s17  ;;  %s25_s19 = int_to_ptr.vmem [resolvable:$true] %s24_s19 }
  0x11   :  { %s828_s20 = scalar_lea.vmem %s62_s17, 2048  ;;  %p833_p6 = scmp.lt.s32.totalorder %s62_s17, %s62_s17 }
  0x12   :  { %p829_p5 = scmp.ne.s32.totalorder %s62_s17, %s828_s20  ;;  %p834_p7 = scmp.lt.s32.totalorder %s828_s20, %s828_s20 }
  0x14   :  { %p835_p8 = por %p834_p7, %p833_p6 }
  0x16   :  { %p836_p9 = pnand %p835_p8, %p829_p5 }
  0x18   :  { %839 = shalt.err (!%p836_p9)
}
  0x19   :  { %67 = dma.hbm_to_vmem [thread:$0]  %s1049_s5, 2048, %s62_s17, [#allocation9], %s929_s12, %s929_s12, %s930_s13  }
  0x1a   :  { %s848_s1 = scalar_lea.vmem %s25_s19, 64  ;;  %p853_p11 = scmp.lt.s32.totalorder %s25_s19, %s25_s19 }
  0x1b   :  { %p849_p10 = scmp.ne.s32.totalorder %s25_s19, %s848_s1  ;;  %p854_p12 = scmp.lt.s32.totalorder %s848_s1, %s848_s1 }
  0x1d   :  { %p855_p13 = por %p854_p12, %p853_p11 }
  0x1f   :  { %p856_p0 = pnand %p855_p13, %p849_p10 }
  0x21   :  { %859 = shalt.err (!%p856_p0)
}
  0x22   :  { %27 = dma.hbm_to_vmem [thread:$0]  %s1044_s0, 64, %s25_s19, [#allocation3]  }
  0x23   :  { %s933_s25 = smov [#allocation7]  }
  0x24   :  { %s47_s26 = sshll.u32 %s933_s25, 4  ;;  %s48_s26 = int_to_ptr.vmem [resolvable:$true] %s47_s26 }
  0x25   :  { %s868_s27 = scalar_lea.vmem %s48_s26, 2048  ;;  %p873_p2 = scmp.lt.s32.totalorder %s48_s26, %s48_s26 }
  0x26   :  { %p869_p1 = scmp.ne.s32.totalorder %s48_s26, %s868_s27  ;;  %p874_p3 = scmp.lt.s32.totalorder %s868_s27, %s868_s27 }
  0x28   :  { %p875_p4 = por %p874_p3, %p873_p2 }
  0x2a   :  { %p876_p5 = pnand %p875_p4, %p869_p1 }
  0x2c   :  { %879 = shalt.err (!%p876_p5)
}
  0x2d   :  { %s934_s5 = smov 128   ;;  %s935_s28 = smov 8  }
  0x2e   :  { %53 = dma.hbm_to_vmem [thread:$0]  %s1047_s3, 2048, %s48_s26, [#allocation6], %s934_s5, %s934_s5, %s935_s28  }
  0x2f   :  { %s936_s10 = smov [#allocation10]  }
  0x30   :  { %s75_s11 = sshll.u32 %s936_s10, 4  ;;  %s76_s11 = int_to_ptr.vmem [resolvable:$true] %s75_s11 }
  0x31   :  { %s888_s0 = scalar_lea.vmem %s76_s11, 1024  ;;  %p893_p7 = scmp.lt.s32.totalorder %s76_s11, %s76_s11 }
  0x32   :  { %p889_p6 = scmp.ne.s32.totalorder %s76_s11, %s888_s0  ;;  %p894_p8 = scmp.lt.s32.totalorder %s888_s0, %s888_s0 }
  0x34   :  { %p895_p9 = por %p894_p8, %p893_p7 }
  0x36   :  { %p896_p10 = pnand %p895_p9, %p889_p6 }
  0x38   :  { %899 = shalt.err (!%p896_p10)
}
  0x39   :  { %81 = dma.hbm_to_vmem [thread:$0]  %s1051_s7, 1024, %s76_s11, [#allocation9], %s929_s12, %s929_s12, %s930_s13  }
  0x3a   :  { %920 = dma.done.wait [#allocation3], 64  }
  0x3b   :  { %921 = vsyncadd [#allocation3], 4294967232 }
  0x3c   :  { %922 = dma.done.wait [#allocation6], 2304  }
  0x3d   :  { %923 = vsyncadd [#allocation6], 4294964992 }
  0x3e   :  { %924 = dma.done.wait [#allocation9], 3072  }
  0x3f   :  { %925 = vsyncadd [#allocation9], 4294964224  ;;  %v937_v0 = vmov 0.0   ;;  %vm938_vm0 = vmmov 0   ;;  %v750_v1 = vld [vmem:[#allocation5 + $0x8] sm:$0xff]   ;;  %v751_v2 = vld [vmem:[#allocation5] sm:$0xff]   ;;  %v188_v50 = vlaneseq }
  0x40   :  { %709 = vmatprep.subr.bf16.mxu0 %v937_v0  ;;  %713 = vmatprep.mubr.msk.bf16.mxu0 %vm938_vm0, %v937_v0  ;;  %v752_v3 = vld [vmem:[#allocation7 + $0x74] ss:$8 sps:$4 sm:$0xff]   ;;  %v754_v4 = vld [vmem:[#allocation7 + $0x70] ss:$8 sps:$4 sm:$0xff]   ;;  %v755_v5 = vld [vmem:[#allocation7 + $0x64] ss:$8 sps:$4 sm:$0xff]  }
  0x41   :  { %710 = vmatpush3.bf16.msra.mxu0 %v750_v1  ;;  %v100_v6 = vld [vmem:[#allocation2] sm:$0xf]  ;;  %278 = vmatprep.subr.bf16.mxu1 %v752_v3  ;;  %vm124_vm1 = vcmask 261120   ;;  %v757_v7 = vld [vmem:[#allocation7 + $0x60] ss:$8 sps:$4 sm:$0xff]   ;;  %v939_v20 = vmov 0  }
  0x42   :  { %711 = vmatprep.subr.bf16.mxu0 %v937_v0  ;;  %279 = vmatpush1.bf16.msra.mxu1 %v754_v4  ;;  %v758_v8 = vld [vmem:[#allocation7 + $0x54] ss:$8 sps:$4 sm:$0xff]   ;;  %v760_v9 = vld [vmem:[#allocation7 + $0x50] ss:$8 sps:$4 sm:$0xff]   ;;  %v761_v10 = vld [vmem:[#allocation7 + $0x44] ss:$8 sps:$4 sm:$0xff]  }
  0x43   :  { %280 = vmatprep.subr.bf16.mxu1 %v755_v5  ;;  %v763_v11 = vld [vmem:[#allocation7 + $0x40] ss:$8 sps:$4 sm:$0xff]   ;;  %v764_v12 = vld [vmem:[#allocation7 + $0x34] ss:$8 sps:$4 sm:$0xff]   ;;  %v766_v13 = vld [vmem:[#allocation7 + $0x30] ss:$8 sps:$4 sm:$0xff]   ;;  %310 = vmatprep.mubr.bf16.mxu1 %v939_v20 }
  0x44   :  { %v767_v14 = vld [vmem:[#allocation7 + $0x24] ss:$8 sps:$4 sm:$0xff]   ;;  %v769_v15 = vld [vmem:[#allocation7 + $0x20] ss:$8 sps:$4 sm:$0xff]   ;;  %v770_v16 = vld [vmem:[#allocation7 + $0x14] ss:$8 sps:$4 sm:$0xff]  }
  0x45   :  { %712 = vmatpush3.bf16.msra.mxu0 %v751_v2  ;;  %v772_v17 = vld [vmem:[#allocation7 + $0x10] ss:$8 sps:$4 sm:$0xff]   ;;  %v773_v18 = vld [vmem:[#allocation7 + $0x4] ss:$8 sps:$4 sm:$0xff]   ;;  %v775_v19 = vld [vmem:[#allocation7] ss:$8 sps:$4 sm:$0xff]  }
  0x46   :  { %281 = vmatpush1.bf16.msra.mxu1 %v757_v7  ;;  %v776_v21 = vld [vmem:[#allocation8 + $0x78] sm:$0xff]   ;;  %v778_v23 = vld [vmem:[#allocation8 + $0x70] sm:$0xff]   ;;  %v780_v25 = vld [vmem:[#allocation8 + $0x68] sm:$0xff]   ;;  %v189_v51 = vshrl.u32 %v188_v50, 7  ;;  %s940_s18 = smov [#allocation11]  }
  0x47   :  { %282 = vmatprep.subr.bf16.mxu1 %v758_v8  ;;  %v777_v22 = vld [vmem:[#allocation8 + $0x38] sm:$0xff]   ;;  %678 = vmatprep.subr.bf16.mxu0 %v776_v21  ;;  %v779_v24 = vld [vmem:[#allocation8 + $0x30] sm:$0xff]   ;;  %v781_v26 = vld [vmem:[#allocation8 + $0x28] sm:$0xff]   ;;  %s618_s19 = sshll.u32 %s940_s18, 4  ;;  %s619_s19 = int_to_ptr.vmem [resolvable:$true] %s618_s19 }
  0x48   :  { %714 = vmatmul.mubr.msk.bf16.vlgmr.msra.gmra.mxu0 %vm124_vm1, %v100_v6  ;;  %v782_v27 = vld [vmem:[#allocation8 + $0x60] sm:$0xff]   ;;  %v784_v29 = vld [vmem:[#allocation8 + $0x58] sm:$0xff]   ;;  %v786_v31 = vld [vmem:[#allocation8 + $0x50] sm:$0xff]   ;;  %v190_v52 = vsub.s32 0, %v189_v51  ;;  %v194_v54 = vsub.s32 1, %v189_v51  ;;  %p905_p12 = scmp.lt.s32.totalorder %s619_s19, %s619_s19 }
  0x49   :  { %679 = vmatpush3.bf16.msra.mxu0 %v777_v22  ;;  %v783_v28 = vld [vmem:[#allocation8 + $0x20] sm:$0xff]   ;;  %v785_v30 = vld [vmem:[#allocation8 + $0x18] sm:$0xff]   ;;  %v787_v32 = vld [vmem:[#allocation8 + $0x10] sm:$0xff]  }
  0x4a   :  { %283 = vmatpush1.bf16.msra.mxu1 %v760_v9  ;;  %680 = vmatprep.subr.bf16.mxu0 %v778_v23  ;;  %v629_v33 = vld [vmem:[%s1046_s2] ss:$0 sm:$0xff]  ;;  %v790_v43 = vld [vmem:[#allocation8 + $0x40] sm:$0xff]   ;;  %v792_v45 = vld [vmem:[#allocation10 + $0x38] sm:$0xff]  }
  0x4b   :  { %284 = vmatprep.subr.bf16.mxu1 %v761_v10  ;;  %v788_v41 = vld [vmem:[#allocation8 + $0x48] sm:$0xff]   ;;  %v791_v44 = vld [vmem:[#allocation8] sm:$0xff]   ;;  %v793_v46 = vld [vmem:[#allocation10 + $0x30] sm:$0xff]  }
  0x4c   :  { %v789_v42 = vld [vmem:[#allocation8 + $0x8] sm:$0xff]   ;;  %v795_v48 = vld [vmem:[#allocation10 + $0x20] sm:$0xff]   ;;  %v796_v49 = vld [vmem:[#allocation10 + $0x18] sm:$0xff]  }
  0x4d   :  { %681 = vmatpush3.bf16.msra.mxu0 %v779_v24  ;;  %v794_v47 = vld [vmem:[#allocation10 + $0x28] sm:$0xff]   ;;  %v797_v4 = vld [vmem:[#allocation10 + $0x10] sm:$0xff]   ;;  %v799_v6 = vld [vmem:[#allocation10] sm:$0xff]  }
  0x4e   :  { %285 = vmatpush1.bf16.msra.mxu1 %v763_v11  ;;  %682 = vmatprep.subr.bf16.mxu0 %v780_v25  ;;  %v186_v53 = vld [vmem:[%s1048_s4] sm:$0x3] }
  0x4f   :  { %286 = vmatprep.subr.bf16.mxu1 %v764_v12  ;;  %v191_v55 = vrot.slane %v186_v53, %v190_v52  ;;  %v195_v56 = vrot.slane %v186_v53, %v194_v54  ;;  %v798_v5 = vld [vmem:[#allocation10 + $0x8] sm:$0xff]  }
  0x50   :  { %v649_v8 = vld [vmem:[%s1050_s6] ss:$0 sm:$0xff]  ;;  %s900_s6 = scalar_lea.vmem %s619_s19, 128 }
  0x51   :  { %683 = vmatpush3.bf16.msra.mxu0 %v781_v26  ;;  %p901_p11 = scmp.ne.s32.totalorder %s619_s19, %s900_s6  ;;  %p906_p13 = scmp.lt.s32.totalorder %s900_s6, %s900_s6 }
  0x52   :  { %287 = vmatpush1.bf16.msra.mxu1 %v766_v13  ;;  %684 = vmatprep.subr.bf16.mxu0 %v782_v27 }
  0x53   :  { %288 = vmatprep.subr.bf16.mxu1 %v767_v14  ;;  %p907_p0 = por %p906_p13, %p905_p12 }
  0x55   :  { %685 = vmatpush3.bf16.msra.mxu0 %v783_v28  ;;  %p908_p1 = pnand %p907_p0, %p901_p11 }
  0x56   :  { %289 = vmatpush1.bf16.msra.mxu1 %v769_v15  ;;  %686 = vmatprep.subr.bf16.mxu0 %v784_v29 }
  0x57   :  { %290 = vmatprep.subr.bf16.mxu1 %v770_v16  ;;  %v666_v16 = vld [vmem:[%s1052_s8] ss:$0 sm:$0xff] }
  0x59   :  { %687 = vmatpush3.bf16.msra.mxu0 %v785_v30 }
  0x5a   :  { %291 = vmatpush1.bf16.msra.mxu1 %v772_v17  ;;  %688 = vmatprep.subr.bf16.mxu0 %v786_v31 }
  0x5b   :  { %292 = vmatprep.subr.bf16.mxu1 %v773_v18 }
  0x5d   :  { %689 = vmatpush3.bf16.msra.mxu0 %v787_v32 }
  0x5e   :  { %293 = vmatpush1.bf16.msra.mxu1 %v775_v19  ;;  %690 = vmatprep.subr.bf16.mxu0 %v788_v41 }
  0x5f   :  { %717 = vmatprep.subr.bf16.mxu1 %v937_v0 }
  0x61   :  { %691 = vmatpush3.bf16.msra.mxu0 %v789_v42 }
  0x62   :  { %692 = vmatprep.subr.bf16.mxu0 %v790_v43 }
  0x65   :  { %693 = vmatpush3.bf16.msra.mxu0 %v791_v44 }
 0x108   :  { %v162_v34 = vpop.f32.mrf.mxu0 }
 0x109   :  { %v163_v35 = vadd.f32 %v629_v33, %v162_v34 }
 0x10a   :  { %v715_v36 = vpop.f32.mrf.mxu0 }
 0x10b   :  { %v168_v37 = vmax.f32 %v163_v35, 0.0 }
 0x10c   :  { %v165_v38 = vpop.f32.mrf.mxu0 }
 0x10d   :  { %v169_v39 = vpack.c.bf16 %v168_v37, %v168_v37 }
 0x10e   :  { %v716_v40 = vpop.f32.mrf.mxu0 }
 0x10f   :  { %311 = vmatmul.mubr.bf16.vlgmr.msra.gmra.mxu1 %v169_v39 }
 0x110   :  { %733 = vmatprep.mubr.msk.bf16.mxu1 %vm938_vm0, %v937_v0  ;;  %718 = vmatpush3.bf16.msra.mxu1 %v792_v45 }
 0x111   :  { %719 = vmatprep.subr.bf16.mxu1 %v937_v0 }
 0x114   :  { %720 = vmatpush3.bf16.msra.mxu1 %v793_v46 }
 0x115   :  { %721 = vmatprep.subr.bf16.mxu1 %v937_v0 }
 0x118   :  { %722 = vmatpush3.bf16.msra.mxu1 %v794_v47 }
 0x119   :  { %723 = vmatprep.subr.bf16.mxu1 %v937_v0 }
 0x11c   :  { %724 = vmatpush3.bf16.msra.mxu1 %v795_v48 }
 0x11d   :  { %725 = vmatprep.subr.bf16.mxu1 %v937_v0 }
 0x120   :  { %726 = vmatpush3.bf16.msra.mxu1 %v796_v49 }
 0x121   :  { %727 = vmatprep.subr.bf16.mxu1 %v937_v0 }
 0x124   :  { %728 = vmatpush3.bf16.msra.mxu1 %v797_v4 }
 0x125   :  { %729 = vmatprep.subr.bf16.mxu1 %v937_v0 }
 0x128   :  { %730 = vmatpush3.bf16.msra.mxu1 %v798_v5 }
 0x129   :  { %731 = vmatprep.subr.bf16.mxu1 %v937_v0 }
 0x12c   :  { %732 = vmatpush3.bf16.msra.mxu1 %v799_v6 }
 0x1cf   :  { %v312_v57 = vpop.f32.mrf.mxu1 }
 0x1d0   :  { %v313_v58 = vadd.f32 %v312_v57, %v191_v55 }
 0x1d1   :  { %v314_v59 = vpop.f32.mrf.mxu1 }
 0x1d2   :  { %v315_v60 = vadd.f32 %v314_v59, %v195_v56  ;;  %v319_v61 = vmax.f32 %v313_v58, 0.0 }
 0x1d3   :  { %v316_v62 = vpop.f32.mrf.mxu1 }
 0x1d4   :  { %v320_v63 = vmax.f32 %v315_v60, 0.0  ;;  %v321_v3 = vpack.c.bf16 %v319_v61, %v319_v61 }
 0x1d5   :  { %v317_v1 = vpop.f32.mrf.mxu1 }
 0x1d6   :  { %v322_v2 = vpack.c.bf16 %v320_v63, %v320_v63 }
 0x1d8   :  { %490 = vmatprep.mubr.bf16.mxu0 %v322_v2 }
 0x1d9   :  { %491 = vmatmul.mubr.bf16.vlgmr.msra.gmra.mxu0 %v321_v3 }
 0x299   :  { %v694_v7 = vpop.f32.mrf.mxu0 }
 0x29b   :  { %v695_v9 = vpop.f32.mrf.mxu0 }
 0x29c   :  { %v696_v10 = vadd.f32 %v695_v9, %v694_v7 }
 0x29d   :  { %v697_v11 = vpop.f32.mrf.mxu0 }
 0x29e   :  { %v493_v12 = vadd.f32 %v696_v10, %v649_v8 }
 0x29f   :  { %v698_v13 = vpop.f32.mrf.mxu0 }
 0x2a0   :  { %v498_v14 = vmax.f32 %v493_v12, 0.0 }
 0x2a2   :  { %v499_v15 = vpack.c.bf16 %v498_v14, %v498_v14 }
 0x2a4   :  { %734 = vmatmul.mubr.bf16.vlgmr.msra.gmra.mxu1 %v499_v15 }
 0x364   :  { %v605_v0 = vpop.f32.mrf.mxu1 }
 0x365   :  { %v606_v17 = vadd.f32 %v666_v16, %v605_v0 }
 0x366   :  { %v735_v18 = vpop.f32.mrf.mxu1 }
 0x367   :  { %611 = vst [vmem:[#allocation11] sm:$0xff] %v606_v17 }
 0x368   :  { %v608_v19 = vpop.f32.mrf.mxu1 }
 0x369   :  { %911 = shalt.err (!%p908_p1)
}
 0x36a   :  { %621 = dma.vmem_to_hbm [thread:$0]  %s619_s19, 128, %s1053_s9, [#allocation4]   ;;  %v736_v20 = vpop.f32.mrf.mxu1 }
 0x36b   :  { %926 = dma.done.wait [#allocation4], 128  }
 0x36c   :  { %927 = vsyncadd [#allocation4], 4294967168 }
 0x36d   :  { %625 = vsyncpa [#allocation3], 1 }
 0x36e   :  { %626 = vsyncpa [#allocation6], 1 }
 0x36f   :  { %627 = vsyncpa [#allocation9], 1 }
 0x370   :  { %628 = vsyncpa [#allocation4], 1 }

</bundles_post_ra>
